<compile_context>
chip_gen: v5e
topology: v5e:2x2
jax: 0.10.0
libtpu: 0.0.40
codegen_flags: <defaults>
</compile_context>

<pallas_src>
import functools

import jax
import jax.numpy as jnp
from jax.experimental import pallas as pl
from jax.experimental.pallas import tpu as pltpu


# Production default: bf16 MXU operands with f32 accumulation (2-4x MXU throughput on
# v5e/v6e/v7x and ~2x less weight/activation DMA).  Pass compute_dtype=None for exact
# f32 (used by the tight correctness check in __main__).
COMPUTE_DTYPE = jnp.bfloat16


# ----------------------------------------------------------------------------
# Generation-aware budgeting helpers
# ----------------------------------------------------------------------------
def _round_up(x, m):
    return (x + m - 1) // m * m


@functools.lru_cache(maxsize=None)
def _vmem_limit_bytes():
    """Explicit scoped-VMEM budget: ~3/4 of physical VMEM, capped at 96 MiB.

    v5e/v6e have 128 MiB physical VMEM -> 96 MiB; v7x has 64 MiB -> 48 MiB.
    Falls back to a conservative 48 MiB if the hardware query is unavailable.
    """
    cap = None
    try:
        cap = getattr(pltpu.get_tpu_info(), "vmem_capacity_bytes", None)
    except Exception:  # pragma: no cover - defensive: query not available
        cap = None
    if not cap:
        cap = 64 * 1024 * 1024
    return int(min(96 * 1024 * 1024, (int(cap) * 3) // 4))


@functools.lru_cache(maxsize=None)
def _default_caps():
    """Tile caps: 512-wide matmul tiles on 128 MiB parts (v5e/v6e), 256 on v7x."""
    big = _vmem_limit_bytes() >= 64 * 1024 * 1024
    return dict(tm=512 if big else 256,
                tn=512 if big else 256,
                tk=512,
                tq=256 if big else 128)


def _tile_and_pad(dim, cap, mult):
    """Pick a block size for one dimension.

    Returns (tile, padded_dim).  Small dims use one full-dim block (always legal).
    Large dims get the biggest multiple-of-`mult` tile <= cap dividing the dim; if
    none exists the dim is zero-padded up to a tile multiple by the wrapper (result
    sliced back), so no oversized fallback block can blow the scoped-VMEM budget.
    """
    if dim <= cap:
        return dim, dim
    tile = cap - (cap % mult)
    t = tile
    while t >= mult:
        if dim % t == 0:
            return t, dim
        t -= mult
    return tile, _round_up(dim, tile)


# ----------------------------------------------------------------------------
# Kernel 1: tiled linear layer  y = x @ W + b  (Q/K/V projections, fused QKV)
# ----------------------------------------------------------------------------
def _linear_kernel(x_ref, w_ref, b_ref, o_ref, acc_ref):
    @pl.when(pl.program_id(2) == 0)
    def _():
        acc_ref[...] = jnp.zeros_like(acc_ref)

    # Operands are already in the compute dtype (cast once in the wrapper).
    acc_ref[...] += jnp.dot(x_ref[...], w_ref[...],
                            preferred_element_type=jnp.float32)

    @pl.when(pl.program_id(2) == pl.num_programs(2) - 1)
    def _():
        o_ref[...] = (acc_ref[...] + b_ref[...]).astype(o_ref.dtype)


def linear(x2d, w, b, *, out_dtype=None, compute_dtype=None):
    """y = x2d @ w + b, tiled over (M, N, K) with a VMEM f32 accumulator."""
    M, K = x2d.shape
    N = w.shape[1]
    if out_dtype is None:
        out_dtype = x2d.dtype
    if compute_dtype is not None:
        x2d = x2d.astype(compute_dtype)
        w = w.astype(compute_dtype)

    caps = _default_caps()
    tm, Mp = _tile_and_pad(M, caps["tm"], 8)
    tn, Np = _tile_and_pad(N, caps["tn"], 128)
    tk, Kp = _tile_and_pad(K, caps["tk"], 128)

    if (Mp, Kp) != (M, K):
        x2d = jnp.pad(x2d, ((0, Mp - M), (0, Kp - K)))
    if (Kp, Np) != (K, N):
        w = jnp.pad(w, ((0, Kp - K), (0, Np - N)))
    b2 = b.reshape(1, N).astype(jnp.float32)
    if Np != N:
        b2 = jnp.pad(b2, ((0, 0), (0, Np - N)))

    out = pl.pallas_call(
        _linear_kernel,
        out_shape=jax.ShapeDtypeStruct((Mp, Np), out_dtype),
        grid=(Mp // tm, Np // tn, Kp // tk),
        in_specs=[
            pl.BlockSpec((tm, tk), lambda i, j, kk: (i, kk)),
            pl.BlockSpec((tk, tn), lambda i, j, kk: (kk, j)),
            pl.BlockSpec((1, tn), lambda i, j, kk: (0, j)),
        ],
        out_specs=pl.BlockSpec((tm, tn), lambda i, j, kk: (i, j)),
        scratch_shapes=[pltpu.VMEM((tm, tn), jnp.float32)],
        compiler_params=pltpu.CompilerParams(
            dimension_semantics=("parallel", "parallel", "arbitrary"),
            vmem_limit_bytes=_vmem_limit_bytes()),
    )(x2d, w, b2)
    return out[:M, :N]


# ----------------------------------------------------------------------------
# Kernel 2: scaled dot-product attention, one (batch, q-row-block) per grid step
#   attn_h = softmax(q_h k_h^T + mask_bias);  ctx_h = attn_h @ v_h
# (1/temperature already folded into the Q projection weights)
# ----------------------------------------------------------------------------
def _attention_kernel(q_ref, k_ref, v_ref, bias_ref, o_ref, a_ref, *,
                      n_head, d_k, d_v, compute_dtype):
    # q_ref:    (1, tq, H*dk)      k_ref: (1, Lk, H*dk)     v_ref: (1, Lk, H*dv)
    # bias_ref: (1, tq, Lk) bf16 additive mask bias (0 visible / -1e9 masked)
    # o_ref:    (1, tq, H*dv)      a_ref: (H, 1, tq, Lk)
    q = q_ref[0]
    k = k_ref[0]
    v = v_ref[0]
    if compute_dtype is not None:
        q = q.astype(compute_dtype)
        k = k.astype(compute_dtype)
        v = v.astype(compute_dtype)
    bias = bias_ref[0].astype(jnp.float32)          # broadcast across heads

    for h in range(n_head):                          # static unroll over heads
        qh = q[:, h * d_k:(h + 1) * d_k]
        kh = k[:, h * d_k:(h + 1) * d_k]
        vh = v[:, h * d_v:(h + 1) * d_v]
        # contraction on the last dim of both operands: no k.T materialization
        s = jax.lax.dot_general(qh, kh, (((1,), (1,)), ((), ())),
                                preferred_element_type=jnp.float32)
        s = s + bias                                 # masked -> ~ -1e9 (finite)
        m = jnp.max(s, axis=-1, keepdims=True)
        e = jnp.exp(s - m)
        l = jnp.sum(e, axis=-1, keepdims=True)
        p = e / l                                    # exact: returned probs sum to 1
        a_ref[h, 0] = p.astype(a_ref.dtype)
        ctx = jax.lax.dot_general(p.astype(vh.dtype), vh,
                                  (((1,), (0,)), ((), ())),
                                  preferred_element_type=jnp.float32)
        # store each head straight into the output VMEM block (no concat, no
        # H live f32 ctx tiles); writeback is still one lane-dense block.
        o_ref[0, :, h * d_v:(h + 1) * d_v] = ctx.astype(o_ref.dtype)


def attention(qh, kh, vh, mask_bias, *, n_head, d_k, d_v,
              compute_dtype=None, attn_dtype=jnp.float32):
    # qh: (B, Lq, H*dk), kh: (B, Lk, H*dk), vh: (B, Lk, H*dv)
    # mask_bias: (B, Lq, Lk) bf16 additive bias
    B, Lq, HDk = qh.shape
    _, Lk, HDv = vh.shape

    # Budget the q tile so the (H, tq, Lk) probability block stays around 4 MiB.
    caps = _default_caps()
    probs_row_bytes = max(1, n_head * Lk * jnp.dtype(attn_dtype).itemsize)
    tq_budget = max(8, (4 * 1024 * 1024 // probs_row_bytes) // 8 * 8)
    tq_cap = min(caps["tq"], tq_budget)
    tq, Lqp = _tile_and_pad(Lq, tq_cap, 8)
    if Lqp != Lq:
        qh = jnp.pad(qh, ((0, 0), (0, Lqp - Lq), (0, 0)))
        mask_bias = jnp.pad(mask_bias, ((0, 0), (0, Lqp - Lq), (0, 0)))

    kern = functools.partial(_attention_kernel, n_head=n_head, d_k=d_k, d_v=d_v,
                             compute_dtype=compute_dtype)
    ctx, attn = pl.pallas_call(
        kern,
        out_shape=(
            jax.ShapeDtypeStruct((B, Lqp, HDv), qh.dtype),
            jax.ShapeDtypeStruct((n_head, B, Lqp, Lk), attn_dtype),
        ),
        grid=(B, Lqp // tq),
        in_specs=[
            pl.BlockSpec((1, tq, HDk), lambda b, i: (b, i, 0)),
            pl.BlockSpec((1, Lk, HDk), lambda b, i: (b, 0, 0)),   # resident per b
            pl.BlockSpec((1, Lk, HDv), lambda b, i: (b, 0, 0)),   # resident per b
            pl.BlockSpec((1, tq, Lk), lambda b, i: (b, i, 0)),
        ],
        out_specs=(
            pl.BlockSpec((1, tq, HDv), lambda b, i: (b, i, 0)),
            pl.BlockSpec((n_head, 1, tq, Lk), lambda b, i: (0, b, i, 0)),
        ),
        compiler_params=pltpu.CompilerParams(
            dimension_semantics=("parallel", "parallel"),   # B and Lq both shardable
            vmem_limit_bytes=_vmem_limit_bytes()),
    )(qh, kh, vh, mask_bias)
    return ctx[:, :Lq], attn[:, :, :Lq]


# ----------------------------------------------------------------------------
# Kernel 3: fused  fc -> dropout(id) -> concat(residual) -> fc1 -> LayerNorm
#   y = LN( (ctx @ Wfc + bfc) @ W1a  +  residual @ W1b  + b1 )
# (the concat is never materialized; W1a/W1b are the two halves of w_fc1)
# ----------------------------------------------------------------------------
def _fc_fc1_ln_kernel(x_ref, r_ref, wfc_ref, bfc_ref, w1a_ref, w1b_ref, b1_ref,
                      g_ref, beta_ref, o_ref, *, eps):
    x = x_ref[...]
    r = r_ref[...]
    fc = jnp.dot(x, wfc_ref[...], preferred_element_type=jnp.float32) + bfc_ref[...]
    fc = fc.astype(x.dtype)                      # back to compute dtype for the MXU
    y = (jnp.dot(fc, w1a_ref[...], preferred_element_type=jnp.float32)
         + jnp.dot(r, w1b_ref[...], preferred_element_type=jnp.float32)
         + b1_ref[...])
    # LayerNorm kept in f32 (v5e VPU/EUP have no bf16).
    mu = jnp.mean(y, axis=-1, keepdims=True)
    var = jnp.mean((y - mu) ** 2, axis=-1, keepdims=True)
    yn = (y - mu) * jax.lax.rsqrt(var + eps)
    o_ref[...] = (yn * g_ref[...] + beta_ref[...]).astype(o_ref.dtype)


def fc_fc1_layernorm(ctx2d, res2d, w_fc, b_fc, w_fc1, b_fc1, gamma, beta, *,
                     out_dtype, compute_dtype=None, eps=1e-6):
    M, Kc = ctx2d.shape
    D = w_fc.shape[1]
    # cat([fc_out, residual]) @ w_fc1 == fc_out @ w_fc1[:D] + residual @ w_fc1[D:]
    w1a = w_fc1[:D]
    w1b = w_fc1[D:]
    if compute_dtype is not None:
        ctx2d = ctx2d.astype(compute_dtype)
        res2d = res2d.astype(compute_dtype)
        w_fc = w_fc.astype(compute_dtype)
        w1a = w1a.astype(compute_dtype)
        w1b = w1b.astype(compute_dtype)

    tm, Mp = _tile_and_pad(M, _default_caps()["tm"], 8)
    if Mp != M:
        ctx2d = jnp.pad(ctx2d, ((0, Mp - M), (0, 0)))
        res2d = jnp.pad(res2d, ((0, Mp - M), (0, 0)))

    kern = functools.partial(_fc_fc1_ln_kernel, eps=eps)
    out = pl.pallas_call(
        kern,
        out_shape=jax.ShapeDtypeStruct((Mp, D), out_dtype),
        grid=(Mp // tm,),
        in_specs=[
            pl.BlockSpec((tm, Kc), lambda i: (i, 0)),
            pl.BlockSpec((tm, D), lambda i: (i, 0)),
            pl.BlockSpec((Kc, D), lambda i: (0, 0)),
            pl.BlockSpec((1, D), lambda i: (0, 0)),
            pl.BlockSpec((D, D), lambda i: (0, 0)),
            pl.BlockSpec((D, D), lambda i: (0, 0)),
            pl.BlockSpec((1, D), lambda i: (0, 0)),
            pl.BlockSpec((1, D), lambda i: (0, 0)),
            pl.BlockSpec((1, D), lambda i: (0, 0)),
        ],
        out_specs=pl.BlockSpec((tm, D), lambda i: (i, 0)),
        compiler_params=pltpu.CompilerParams(
            dimension_semantics=("parallel",),
            vmem_limit_bytes=_vmem_limit_bytes()),
    )(ctx2d, res2d, w_fc, b_fc.reshape(1, D).astype(jnp.float32), w1a, w1b,
      b_fc1.reshape(1, D).astype(jnp.float32),
      gamma.reshape(1, D).astype(jnp.float32),
      beta.reshape(1, D).astype(jnp.float32))
    return out[:M]


# ----------------------------------------------------------------------------
# MultiHeadAttention forward (glue in plain JAX, hot paths in Pallas)
# ----------------------------------------------------------------------------
def multi_head_attention(params, q, k, v, mask, *,
                         compute_dtype=COMPUTE_DTYPE, attn_dtype=None):
    n_head = params["n_head"]
    d_k = params["d_k"]
    d_v = params["d_v"]
    sz_b, len_q, d_model = q.shape
    _, len_k, _ = k.shape
    residual = q
    out_dtype = q.dtype
    if attn_dtype is None:
        # bf16 probability writeback (dominant HBM traffic) in the bf16 MXU mode.
        attn_dtype = compute_dtype if compute_dtype is not None else jnp.float32
    proj_dtype = compute_dtype if compute_dtype is not None else q.dtype

    # Fold 1/temperature into the Q projection weights (zero in-kernel cost).
    inv_temp = 1.0 / (float(d_k) ** 0.5)
    w_qs = params["w_qs"] * inv_temp
    b_qs = params["b_qs"] * inv_temp

    if (q is k) and (k is v):
        # Self-attention: one fused [Wq|Wk|Wv] matmul reads the activation once.
        w_qkv = jnp.concatenate([w_qs, params["w_ks"], params["w_vs"]], axis=1)
        b_qkv = jnp.concatenate([b_qs, params["b_ks"], params["b_vs"]])
        qkv = linear(q.reshape(-1, d_model), w_qkv, b_qkv,
                     out_dtype=proj_dtype, compute_dtype=compute_dtype)
        nqk = n_head * d_k
        qp = qkv[:, :nqk]
        kp = qkv[:, nqk:2 * nqk]
        vp = qkv[:, 2 * nqk:]
    else:
        qp = linear(q.reshape(-1, d_model), w_qs, b_qs,
                    out_dtype=proj_dtype, compute_dtype=compute_dtype)
        kp = linear(k.reshape(-1, d_model), params["w_ks"], params["b_ks"],
                    out_dtype=proj_dtype, compute_dtype=compute_dtype)
        vp = linear(v.reshape(-1, d_model), params["w_vs"], params["b_vs"],
                    out_dtype=proj_dtype, compute_dtype=compute_dtype)

    # Free reshapes only — the head split happens inside the attention kernel,
    # so there are no HBM transposes around attention.
    qh = qp.reshape(sz_b, len_q, n_head * d_k)
    kh = kp.reshape(sz_b, len_k, n_head * d_k)
    vh = vp.reshape(sz_b, len_k, n_head * d_v)

    # (B, Lq, Lk) additive mask bias in bf16 (0 visible / -1e9 masked), passed once
    # and broadcast across heads in the kernel (no n_head tiling, 4x less DMA vs i32).
    mask_bias = jnp.where(mask, -1e9, 0.0).astype(jnp.bfloat16)

    ctx, attn = attention(qh, kh, vh, mask_bias, n_head=n_head, d_k=d_k, d_v=d_v,
                          compute_dtype=compute_dtype, attn_dtype=attn_dtype)

    # ctx is already (B, Lq, n_head*d_v) in head-major column order -> no transpose.
    # attn is (n_head, B, Lq, Lk); contiguous reshape to PyTorch's (n_head*B, Lq, Lk).
    attn = attn.reshape(n_head * sz_b, len_q, len_k)

    # Fused: fc -> dropout(identity) -> concat(residual) -> fc1 -> LayerNorm.
    out = fc_fc1_layernorm(ctx.reshape(-1, n_head * d_v),
                           residual.reshape(-1, d_model),
                           params["w_fc"], params["b_fc"],
                           params["w_fc1"], params["b_fc1"],
                           params["ln_gamma"], params["ln_beta"],
                           out_dtype=out_dtype, compute_dtype=compute_dtype)
    return out.reshape(sz_b, len_q, d_model), attn


# ----------------------------------------------------------------------------
# Pure-JAX reference for correctness checking
# ----------------------------------------------------------------------------
def reference_mha(params, q, k, v, mask):
    n_head, d_k, d_v = params["n_head"], params["d_k"], params["d_v"]
    sz_b, len_q, d_model = q.shape
    _, len_k, _ = k.shape
    residual = q
    qp = (q @ params["w_qs"] + params["b_qs"]).reshape(sz_b, len_q, n_head, d_k)
    kp = (k @ params["w_ks"] + params["b_ks"]).reshape(sz_b, len_k, n_head, d_k)
    vp = (v @ params["w_vs"] + params["b_vs"]).reshape(sz_b, len_k, n_head, d_v)
    qp = qp.transpose(2, 0, 1, 3).reshape(-1, len_q, d_k)
    kp = kp.transpose(2, 0, 1, 3).reshape(-1, len_k, d_k)
    vp = vp.transpose(2, 0, 1, 3).reshape(-1, len_k, d_v)
    m = jnp.tile(mask, (n_head, 1, 1))
    s = jnp.einsum("bqd,bkd->bqk", qp, kp) / (float(d_k) ** 0.5)
    s = jnp.where(m, -jnp.inf, s)
    p = jax.nn.softmax(s, axis=-1)
    o = jnp.einsum("bqk,bkd->bqd", p, vp)
    o = o.reshape(n_head, sz_b, len_q, d_v).transpose(1, 2, 0, 3).reshape(sz_b, len_q, -1)
    o = o @ params["w_fc"] + params["b_fc"]
    cat = jnp.concatenate([o, residual], axis=2)
    y = cat @ params["w_fc1"] + params["b_fc1"]
    mu = y.mean(-1, keepdims=True)
    var = ((y - mu) ** 2).mean(-1, keepdims=True)
    y = (y - mu) * jax.lax.rsqrt(var + 1e-6) * params["ln_gamma"] + params["ln_beta"]
    return y, p


if __name__ == "__main__":
    # Small shapes consistent with the module.
    n_head, d_model, d_k, d_v = 4, 32, 8, 8
    sz_b, seq_len = 2, 8

    key = jax.random.PRNGKey(0)
    keys = jax.random.split(key, 16)

    def init_w(kk, fan_in, fan_out):
        bound = 1.0 / (fan_in ** 0.5)
        return jax.random.uniform(kk, (fan_in, fan_out), jnp.float32, -bound, bound)

    params = dict(
        n_head=n_head, d_k=d_k, d_v=d_v,
        w_qs=init_w(keys[0], d_model, n_head * d_k),
        b_qs=jax.random.uniform(keys[1], (n_head * d_k,), jnp.float32, -0.1, 0.1),
        w_ks=init_w(keys[2], d_model, n_head * d_k),
        b_ks=jax.random.uniform(keys[3], (n_head * d_k,), jnp.float32, -0.1, 0.1),
        w_vs=init_w(keys[4], d_model, n_head * d_v),
        b_vs=jax.random.uniform(keys[5], (n_head * d_v,), jnp.float32, -0.1, 0.1),
        w_fc=init_w(keys[6], n_head * d_v, d_model),
        b_fc=jax.random.uniform(keys[7], (d_model,), jnp.float32, -0.1, 0.1),
        w_fc1=init_w(keys[8], 2 * d_model, d_model),
        b_fc1=jax.random.uniform(keys[9], (d_model,), jnp.float32, -0.1, 0.1),
        ln_gamma=jnp.ones((d_model,), jnp.float32),
        ln_beta=jnp.zeros((d_model,), jnp.float32),
    )

    x = jax.random.normal(keys[10], (sz_b, seq_len, d_model), jnp.float32)
    k_in = jax.random.normal(keys[11], (sz_b, seq_len, d_model), jnp.float32)
    v_in = jax.random.normal(keys[12], (sz_b, seq_len, d_model), jnp.float32)

    # Causal-style boolean mask (True = masked), every row keeps >=1 valid key.
    idx = jnp.arange(seq_len)
    mask = (idx[None, :] > idx[:, None])[None, :, :].repeat(sz_b, axis=0)

    # ---- run 1: exact f32 path, self-attention (exercises the fused QKV matmul) ----
    out, attn = multi_head_attention(params, x, x, x, mask,
                                     compute_dtype=None, attn_dtype=jnp.float32)
    out = jax.block_until_ready(out)
    attn = jax.block_until_ready(attn)
    ref_out, ref_attn = reference_mha(params, x, x, x, mask)
    assert out.shape == (sz_b, seq_len, d_model)
    assert attn.shape == (n_head * sz_b, seq_len, seq_len)
    assert jnp.allclose(attn, ref_attn, atol=1e-4, rtol=1e-4), \
        float(jnp.max(jnp.abs(attn - ref_attn)))
    assert jnp.allclose(out, ref_out, atol=2e-3, rtol=2e-3), \
        float(jnp.max(jnp.abs(out - ref_out)))

    # ---- run 2: bf16 MXU path (production default), cross-attention ----
    out_b, attn_b = multi_head_attention(params, x, k_in, v_in, mask)
    out_b = jax.block_until_ready(out_b)
    attn_b = jax.block_until_ready(attn_b)
    ref_out_b, ref_attn_b = reference_mha(params, x, k_in, v_in, mask)
    assert out_b.shape == (sz_b, seq_len, d_model)
    assert attn_b.shape == (n_head * sz_b, seq_len, seq_len)
    # bf16 operands + bf16 probability storage => loose sanity tolerances here;
    # the strict numeric check is run 1 above.
    assert jnp.allclose(attn_b.astype(jnp.float32), ref_attn_b, atol=8e-2), \
        float(jnp.max(jnp.abs(attn_b.astype(jnp.float32) - ref_attn_b)))
    assert jnp.allclose(out_b.astype(jnp.float32), ref_out_b, atol=2.5e-1, rtol=2.5e-1), \
        float(jnp.max(jnp.abs(out_b.astype(jnp.float32) - ref_out_b)))

    print("KERNEL_OK")
</pallas_src>

<mosaic_0001>
module attributes {stable_mosaic.version = 11 : i64} {
  func.func @_linear_kernel(%arg0: i32, %arg1: i32, %arg2: i32, %arg3: memref<16x32xf32, #tpu.memory_space<vmem>>, %arg4: memref<32x96xf32, #tpu.memory_space<vmem>>, %arg5: memref<1x96xf32, #tpu.memory_space<vmem>>, %arg6: memref<16x96xf32, #tpu.memory_space<vmem>>, %arg7: memref<16x96xf32, #tpu.memory_space<vmem>>) attributes {dimension_semantics = [#tpu.dimension_semantics<parallel>, #tpu.dimension_semantics<parallel>, #tpu.dimension_semantics<arbitrary>], iteration_bounds = array<i64: 1, 1, 1>, scalar_prefetch = 0 : i64, scratch_operands = 1 : i64, tpu.core_type = #tpu.core_type<tc>, window_params = [{transform_indices = @transform_0, window_bounds = array<i64: 16, 32>}, {transform_indices = @transform_1, window_bounds = array<i64: 32, 96>}, {transform_indices = @transform_2, window_bounds = array<i64: 1, 96>}, {transform_indices = @transform_3, window_bounds = array<i64: 16, 96>}]} {
    %c0_i32 = arith.constant 0 : i32
    %0 = arith.cmpi eq, %arg2, %c0_i32 : i32
    %1 = arith.extui %0 : i1 to i32
    %c0_i32_0 = arith.constant 0 : i32
    %2 = arith.cmpi ne, %1, %c0_i32_0 : i32
    scf.if %2 {
      %cst_10 = arith.constant 0.000000e+00 : f32
      %12 = vector.broadcast %cst_10 : f32 to vector<16x96xf32>
      %c0_11 = arith.constant 0 : index
      %c0_12 = arith.constant 0 : index
      %13 = vector.load %arg7[%c0_11, %c0_12] : memref<16x96xf32, #tpu.memory_space<vmem>>, vector<16x96xf32>
      tpu.vector_store %arg7[%c0_11, %c0_12], %12 {strides = array<i32>} : memref<16x96xf32, #tpu.memory_space<vmem>>, vector<16x96xf32>,
    } else {
    }
    %c0 = arith.constant 0 : index
    %c0_1 = arith.constant 0 : index
    %3 = vector.load %arg7[%c0, %c0_1] : memref<16x96xf32, #tpu.memory_space<vmem>>, vector<16x96xf32>
    %c0_2 = arith.constant 0 : index
    %c0_3 = arith.constant 0 : index
    %4 = vector.load %arg3[%c0_2, %c0_3] : memref<16x32xf32, #tpu.memory_space<vmem>>, vector<16x32xf32>
    %c0_4 = arith.constant 0 : index
    %c0_5 = arith.constant 0 : index
    %5 = vector.load %arg4[%c0_4, %c0_5] : memref<32x96xf32, #tpu.memory_space<vmem>>, vector<32x96xf32>
    %cst = arith.constant dense<0.000000e+00> : vector<16x96xf32>
    %6 = tpu.matmul %4, %5, %cst {dimension_numbers = #tpu.dot_dimension_numbers<[1], [0], [0], [1], [0, 0, 1, 1], [], []>} : vector<16x32xf32>, vector<32x96xf32>, vector<16x96xf32> -> vector<16x96xf32>
    %7 = arith.addf %3, %6 : vector<16x96xf32>
    %c0_6 = arith.constant 0 : index
    %c0_7 = arith.constant 0 : index
    %8 = vector.load %arg7[%c0_6, %c0_7] : memref<16x96xf32, #tpu.memory_space<vmem>>, vector<16x96xf32>
    tpu.vector_store %arg7[%c0_6, %c0_7], %7 {strides = array<i32>} : memref<16x96xf32, #tpu.memory_space<vmem>>, vector<16x96xf32>,
    %c0_i32_8 = arith.constant 0 : i32
    %9 = arith.cmpi eq, %arg2, %c0_i32_8 : i32
    %10 = arith.extui %9 : i1 to i32
    %c0_i32_9 = arith.constant 0 : i32
    %11 = arith.cmpi ne, %10, %c0_i32_9 : i32
    scf.if %11 {
      %c0_10 = arith.constant 0 : index
      %c0_11 = arith.constant 0 : index
      %12 = vector.load %arg7[%c0_10, %c0_11] : memref<16x96xf32, #tpu.memory_space<vmem>>, vector<16x96xf32>
      %c0_12 = arith.constant 0 : index
      %c0_13 = arith.constant 0 : index
      %13 = vector.load %arg5[%c0_12, %c0_13] : memref<1x96xf32, #tpu.memory_space<vmem>>, vector<1x96xf32>
      %14 = vector.broadcast %13 : vector<1x96xf32> to vector<16x96xf32>
      %15 = arith.addf %12, %14 : vector<16x96xf32>
      %c0_14 = arith.constant 0 : index
      %c0_15 = arith.constant 0 : index
      %16 = vector.load %arg6[%c0_14, %c0_15] : memref<16x96xf32, #tpu.memory_space<vmem>>, vector<16x96xf32>
      tpu.vector_store %arg6[%c0_14, %c0_15], %15 {strides = array<i32>} : memref<16x96xf32, #tpu.memory_space<vmem>>, vector<16x96xf32>,
    } else {
    }
    return
  }
  func.func @transform_0(%arg0: i32, %arg1: i32, %arg2: i32) -> (i32, i32) {
    %c0_i32 = arith.constant 0 : i32
    return %arg0, %arg2 : i32, i32
  }
  func.func @transform_1(%arg0: i32, %arg1: i32, %arg2: i32) -> (i32, i32) {
    %c0_i32 = arith.constant 0 : i32
    return %arg2, %arg1 : i32, i32
  }
  func.func @transform_2(%arg0: i32, %arg1: i32, %arg2: i32) -> (i32, i32) {
    %c0_i32 = arith.constant 0 : i32
    %c0_i32_0 = arith.constant 0 : i32
    return %c0_i32, %arg1 : i32, i32
  }
  func.func @transform_3(%arg0: i32, %arg1: i32, %arg2: i32) -> (i32, i32) {
    %c0_i32 = arith.constant 0 : i32
    return %arg0, %arg1 : i32, i32
  }
}

</mosaic_0001>

<bundles_post_ra>
// kernel: tpu_custom_call.1
= control target key start
LH: loop header
LB: loop body
LE: loop exit
PB: predicated region body
PF: predicated region fallthrough
CT: control target
= control target key end

     0   :  { %8 = vsyncpa [#allocation4], 0  ;;  %s274_s0 = inlined_call_operand.hbm [shape: f32[16,32], index: 0, kind: input, shape index: {}]   ;;  %s275_s1 = inlined_call_operand.hbm [shape: f32[32,96], index: 1, kind: input, shape index: {}]   ;;  %s276_s2 = inlined_call_operand.vmem [shape: f32[1,96], index: 2, kind: input, shape index: {}]   ;;  %s277_s3 = inlined_call_operand.hbm [shape: f32[16,96], index: 3, kind: output, shape index: {}]  }
   0x1   :  { %9 = vsyncpa [#allocation7], 0 }
   0x2   :  { %10 = vsyncpa [#allocation5], 0  ;;  %s15_s14 = sshll.u32 %s274_s0, 4  ;;  %s221_s15 = smov [#allocation3]   ;;  %s16_s14 = int_to_ptr.hbm [resolvable:$true] %s15_s14 }
   0x3   :  { %s17_s16 = sshll.u32 %s221_s15, 4  ;;  %s28_s19 = sshll.u32 %s275_s1, 4  ;;  %s18_s16 = int_to_ptr.vmem [resolvable:$true] %s17_s16  ;;  %s29_s19 = int_to_ptr.hbm [resolvable:$true] %s28_s19 }
   0x4   :  { %s222_s20 = smov 128   ;;  %s223_s21 = smov 8  }
   0x5   :  { %23 = dma.hbm_to_vmem [thread:$0]  %s16_s14, 256, %s18_s16, [#allocation4], %s222_s20, %s222_s20, %s223_s21  }
   0x6   :  { %s224_s22 = smov [#allocation6]  }
   0x7   :  { %s30_s23 = sshll.u32 %s224_s22, 4  ;;  %s31_s23 = int_to_ptr.vmem [resolvable:$true] %s30_s23 }
   0x8   :  { %36 = dma.hbm_to_vmem [thread:$0]  %s29_s19, 512, %s31_s23, [#allocation7], %s222_s20, %s222_s20, %s223_s21  }
   0x9   :  { %215 = dma.done.wait [#allocation4], 256  }
   0xa   :  { %216 = vsyncadd [#allocation4], 4294967040 }
   0xb   :  { %217 = dma.done.wait [#allocation7], 512  }
   0xc   :  { %218 = vsyncadd [#allocation7], 4294966784  ;;  %vm51_vm0 = vcmask 785408   ;;  %v225_v0 = vmov 0.0   ;;  %v61_v1 = vld [vmem:[#allocation6 + $0x18] sm:$0xff]  ;;  %v60_v2 = vld [vmem:[#allocation6 + $0x10] sm:$0xff] }
   0xd   :  { %52 = vst.msk [vmem:[#allocation2] sm:$0xff] %vm51_vm0, %v225_v0  ;;  %81 = vmatpush.msra.mxu0 %v61_v1  ;;  %132 = vmatpush.msra.mxu1 %v61_v1  ;;  %v59_v3 = vld [vmem:[#allocation6 + $0x8] sm:$0xff]  ;;  %v58_v4 = vld [vmem:[#allocation6] sm:$0xff]  ;;  %v56_v5 = vld [vmem:[#allocation3] sm:$0xff]  ;;  %vm62_vm1 = vcmask 261120   ;;  %s226_s24 = smov [#allocation8]  }
   0xe   :  { %53 = vst.msk [vmem:[#allocation2 + $0x8] sm:$0xff] %vm51_vm0, %v225_v0  ;;  %v57_v6 = vld [vmem:[#allocation3 + $0x8] sm:$0xff]  ;;  %v142_v13 = vld [vmem:[%s276_s2] ss:$0 sm:$0xff]  ;;  %s114_s25 = sshll.u32 %s226_s24, 4  ;;  %s116_s28 = sshll.u32 %s277_s3, 4  ;;  %s115_s25 = int_to_ptr.vmem [resolvable:$true] %s114_s25  ;;  %s117_s28 = int_to_ptr.hbm [resolvable:$true] %s116_s28 }
   0xf   :  { %82 = vmatpush.msra.mxu0 %v60_v2  ;;  %133 = vmatpush.msra.mxu1 %v60_v2 }
  0x11   :  { %83 = vmatpush.msra.mxu0 %v59_v3  ;;  %134 = vmatpush.msra.mxu1 %v59_v3 }
  0x13   :  { %84 = vmatpush.msra.mxu0 %v58_v4  ;;  %135 = vmatpush.msra.mxu1 %v58_v4 }
  0x14   :  { %130 = vmatmul.msk.f32.vlgmr.msra.gmra.mxu0 %vm62_vm1, %v56_v5  ;;  %131 = vmatmul.msk.f32.vlgmr.msra.gmra.mxu1 %vm62_vm1, %v57_v6  ;;  %v54_v7 = vld [vmem:[#allocation2] sm:$0xff] }
  0x15   :  { %v55_v8 = vld [vmem:[#allocation2 + $0x8] sm:$0xff] }
  0x91   :  { %v86_v9 = vpop.f32.mrf.mxu0  ;;  %v89_v10 = vpop.f32.mrf.mxu1 }
  0x92   :  { %v92_v11 = vadd.f32 %v86_v9, %v54_v7  ;;  %v93_v12 = vadd.f32 %v89_v10, %v55_v8 }
  0x94   :  { %95 = vst.msk [vmem:[#allocation2] sm:$0xff] %vm51_vm0, %v92_v11 }
  0x95   :  { %96 = vst.msk [vmem:[#allocation2 + $0x8] sm:$0xff] %vm51_vm0, %v93_v12 }
  0x9b   :  { %v100_v14 = vld [vmem:[#allocation2] sm:$0xff] }
  0x9c   :  { %v101_v15 = vld [vmem:[#allocation2 + $0x8] sm:$0xff]  ;;  %v106_v16 = vadd.f32 %v142_v13, %v100_v14 }
  0x9d   :  { %v107_v17 = vadd.f32 %v142_v13, %v101_v15 }
  0x9e   :  { %108 = vst.msk [vmem:[#allocation8] sm:$0xff] %vm51_vm0, %v106_v16 }
  0x9f   :  { %109 = vst.msk [vmem:[#allocation8 + $0x8] sm:$0xff] %vm51_vm0, %v107_v17 }
  0xa0   :  { %122 = dma.vmem_to_hbm [thread:$0]  %s115_s25, 256, %s117_s28, [#allocation5], %s222_s20, %s222_s20, %s223_s21  }
  0xa1   :  { %219 = dma.done.wait [#allocation5], 256  }
  0xa2   :  { %220 = vsyncadd [#allocation5], 4294967040 }
  0xa3   :  { %127 = vsyncpa [#allocation4], 1 }
  0xa4   :  { %128 = vsyncpa [#allocation7], 1 }
  0xa5   :  { %129 = vsyncpa [#allocation5], 1 }

</bundles_post_ra>
